<compile_context>
chip_gen: v6e
topology: v6e:2x2x1
jax: 0.10.0
libtpu: 0.0.40
codegen_flags: <defaults>
</compile_context>

<pallas_src>
import math

import jax
import jax.numpy as jnp
from jax.experimental import pallas as pl
from jax.experimental.pallas import tpu as pltpu


def _lane_tile(x, reps):
    """Concat `reps` copies of x along the last axis using O(log reps) concats."""
    if reps <= 1:
        return x
    pieces = []
    cur = x
    r = int(reps)
    while r:
        if r & 1:
            pieces.append(cur)
        r >>= 1
        if r:
            cur = jnp.concatenate([cur, cur], axis=-1)
    return pieces[0] if len(pieces) == 1 else jnp.concatenate(pieces, axis=-1)


def _sinusoidal_kernel(f_rep_ref, x_ref, o_ref):
    # f_rep_ref: (1, H*n)   x_ref: (TB, n)   o_ref: (TB, 2*H*n)
    x = x_ref[...]                                   # (TB, n)
    n = x.shape[1]
    hn = f_rep_ref.shape[1]
    reps = hn // n                                   # = H (static)
    # Lane-replicate the input tile: x_rep[b, h*n + j] = x[b, j]
    # via log2 doubling (O(log H) lane concats, stays 2D, no reshape).
    x_rep = _lane_tile(x, reps)                      # (TB, H*n)
    prod = f_rep_ref[...] * x_rep                    # exact f32 VPU multiply
    if hn % 128 == 0:
        # Lane-aligned half-row stores; only `prod` stays live across both.
        o_ref[:, :hn] = jnp.sin(prod)
        o_ref[:, hn:] = jnp.cos(prod)
    else:
        # Narrow embedding: single full-row store halves the masked stores.
        o_ref[...] = jnp.concatenate([jnp.sin(prod), jnp.cos(prod)], axis=-1)


def make_factors(dim_out=32, max_freq=1000.0, min_freq=1.0, dtype=jnp.float32):
    """Deterministic (buffer) parameter, same as the PyTorch __init__."""
    if dim_out % 2 != 0:
        raise ValueError("dim_out should be divisible by 2")
    half = dim_out // 2
    freqs = jnp.exp(
        jnp.linspace(math.log(min_freq), math.log(max_freq), half, dtype=dtype)
    )
    return (freqs * (2.0 * math.pi)).reshape(1, half)   # (1, dim_out // 2)


def _round_up(v, m):
    return -(-v // m) * m


def sinusoidal_embedding(x, factors, *, block_b=None,
                         vmem_budget_bytes=8 * 1024 * 1024):
    """x: (B, n) float32, factors: (1, H).  Returns (B, 2*H*n)."""
    if x.ndim != 2:
        raise ValueError("Got invalid shape %s, input should be (-1, n)" % str(x.shape))
    B, n = x.shape
    H = factors.shape[1]
    hn = H * n
    out_cols = 2 * hn

    # Lane-dense replicated factors: f_rep[0, h*n + j] = factors[0, h].
    f_rep = jnp.repeat(factors, n, axis=1).astype(x.dtype)     # (1, H*n)

    if block_b is None:
        # Per-row VMEM bytes: double-buffered input tile + double-buffered
        # output tile (f32).  Intermediates live in vregs / compiler scratch.
        bytes_per_row = 4 * (2 * n + 2 * out_cols)
        block_b = vmem_budget_bytes // max(bytes_per_row, 1)
        block_b = max(8, min(2048, int(block_b)))
        # Keep the grid at >= 2 steps when B allows it (v7x has 2 TensorCores;
        # "parallel" can only shard a multi-step grid).
        block_b = min(block_b, max(8, _round_up(pl.cdiv(B, 2), 8)))
    block_b = max(8, (int(block_b) // 8) * 8)

    grid_b = pl.cdiv(B, block_b)   # partial last block handled by Pallas masking

    out = pl.pallas_call(
        _sinusoidal_kernel,
        out_shape=jax.ShapeDtypeStruct((B, out_cols), x.dtype),
        grid=(grid_b,),
        in_specs=[
            pl.BlockSpec((1, hn), lambda i: (0, 0)),            # replicated factors
            pl.BlockSpec((block_b, n), lambda i: (i, 0)),       # batch tile of x
        ],
        out_specs=pl.BlockSpec((block_b, out_cols), lambda i: (i, 0)),
        compiler_params=pltpu.CompilerParams(
            dimension_semantics=("parallel",),                  # megacore sharding
        ),
    )(f_rep, x)
    return out


def _reference(x, factors):
    B, n = x.shape
    H = factors.shape[1]
    prod = factors.reshape(1, H, 1) * x.reshape(B, 1, n)
    s = jnp.sin(prod).reshape(B, -1)
    c = jnp.cos(prod).reshape(B, -1)
    return jnp.concatenate([s, c], axis=1)


if __name__ == "__main__":
    key = jax.random.PRNGKey(0)

    # Primary test: module defaults (dim_out=32 -> H=16), n=8, batch=2.
    B, n, dim_out = 2, 8, 32
    x = jax.random.normal(key, (B, n), dtype=jnp.float32)
    factors = make_factors(dim_out=dim_out)                     # (1, 16)
    out = jax.block_until_ready(sinusoidal_embedding(x, factors))
    ref = _reference(x, factors)
    assert out.shape == (B, dim_out * n), out.shape
    assert jnp.allclose(out, ref, atol=1e-5, rtol=1e-5), "mismatch (primary)"

    # Secondary test: narrow embedding (H*n = 32 < 128), B not a tile multiple.
    B2, n2, dim_out2 = 10, 8, 8
    x2 = jax.random.normal(jax.random.PRNGKey(0), (B2, n2), dtype=jnp.float32)
    factors2 = make_factors(dim_out=dim_out2)                   # (1, 4)
    out2 = jax.block_until_ready(sinusoidal_embedding(x2, factors2))
    ref2 = _reference(x2, factors2)
    assert out2.shape == (B2, dim_out2 * n2), out2.shape
    assert jnp.allclose(out2, ref2, atol=1e-5, rtol=1e-5), "mismatch (secondary)"

    # Tertiary test: multi-step grid with a partial last block (no pad/slice).
    B3, n3, dim_out3 = 300, 8, 32
    x3 = jax.random.normal(jax.random.PRNGKey(0), (B3, n3), dtype=jnp.float32)
    factors3 = make_factors(dim_out=dim_out3)
    out3 = jax.block_until_ready(sinusoidal_embedding(x3, factors3))
    ref3 = _reference(x3, factors3)
    assert out3.shape == (B3, dim_out3 * n3), out3.shape
    assert jnp.allclose(out3, ref3, atol=1e-5, rtol=1e-5), "mismatch (tertiary)"

    print("KERNEL_OK")
</pallas_src>

<mosaic_0001>
module attributes {stable_mosaic.version = 11 : i64} {
  func.func @_sinusoidal_kernel(%arg0: i32, %arg1: memref<1x128xf32, #tpu.memory_space<vmem>>, %arg2: memref<8x8xf32, #tpu.memory_space<vmem>>, %arg3: memref<8x256xf32, #tpu.memory_space<vmem>>) attributes {dimension_semantics = [#tpu.dimension_semantics<parallel>], iteration_bounds = array<i64: 1>, scalar_prefetch = 0 : i64, scratch_operands = 0 : i64, tpu.core_type = #tpu.core_type<tc>, window_params = [{pipeline_mode = #tpu.pipeline_mode<synchronous>, transform_indices = @transform_0, window_bounds = array<i64: 1, 128>}, {transform_indices = @transform_1, window_bounds = array<i64: 8, 8>}, {transform_indices = @transform_2, window_bounds = array<i64: 8, 256>}]} {
    %c0 = arith.constant 0 : index
    %c0_0 = arith.constant 0 : index
    %0 = vector.load %arg2[%c0, %c0_0] : memref<8x8xf32, #tpu.memory_space<vmem>>, vector<8x8xf32>
    %1 = tpu.concatenate %0, %0 in 1 : vector<8x8xf32>, vector<8x8xf32> -> vector<8x16xf32>
    %2 = tpu.concatenate %1, %1 in 1 : vector<8x16xf32>, vector<8x16xf32> -> vector<8x32xf32>
    %3 = tpu.concatenate %2, %2 in 1 : vector<8x32xf32>, vector<8x32xf32> -> vector<8x64xf32>
    %4 = tpu.concatenate %3, %3 in 1 : vector<8x64xf32>, vector<8x64xf32> -> vector<8x128xf32>
    %c0_1 = arith.constant 0 : index
    %c0_2 = arith.constant 0 : index
    %5 = vector.load %arg1[%c0_1, %c0_2] : memref<1x128xf32, #tpu.memory_space<vmem>>, vector<1x128xf32>
    %6 = vector.broadcast %5 : vector<1x128xf32> to vector<8x128xf32>
    %7 = arith.mulf %6, %4 : vector<8x128xf32>
    %8 = math.sin %7 : vector<8x128xf32>
    %c0_3 = arith.constant 0 : index
    %c0_4 = arith.constant 0 : index
    %9 = vector.load %arg3[%c0_3, %c0_4] : memref<8x256xf32, #tpu.memory_space<vmem>>, vector<8x128xf32>
    tpu.vector_store %arg3[%c0_3, %c0_4], %8 {strides = array<i32>} : memref<8x256xf32, #tpu.memory_space<vmem>>, vector<8x128xf32>,
    %10 = math.cos %7 : vector<8x128xf32>
    %c0_5 = arith.constant 0 : index
    %c128 = arith.constant 128 : index
    %11 = vector.load %arg3[%c0_5, %c128] : memref<8x256xf32, #tpu.memory_space<vmem>>, vector<8x128xf32>
    tpu.vector_store %arg3[%c0_5, %c128], %10 {strides = array<i32>} : memref<8x256xf32, #tpu.memory_space<vmem>>, vector<8x128xf32>,
    return
  }
  func.func @transform_0(%arg0: i32) -> (i32, i32) {
    %c0_i32 = arith.constant 0 : i32
    %c0_i32_0 = arith.constant 0 : i32
    %c0_i32_1 = arith.constant 0 : i32
    return %c0_i32, %c0_i32_0 : i32, i32
  }
  func.func @transform_1(%arg0: i32) -> (i32, i32) {
    %c0_i32 = arith.constant 0 : i32
    %c0_i32_0 = arith.constant 0 : i32
    return %arg0, %c0_i32 : i32, i32
  }
  func.func @transform_2(%arg0: i32) -> (i32, i32) {
    %c0_i32 = arith.constant 0 : i32
    %c0_i32_0 = arith.constant 0 : i32
    return %arg0, %c0_i32 : i32, i32
  }
}

</mosaic_0001>

<bundles_post_ra>
// kernel: tpu_custom_call.1
= control target key start
LH: loop header
LB: loop body
LE: loop exit
PB: predicated region body
PF: predicated region fallthrough
CT: control target
= control target key end

     0   :  { %7 = vsyncpa [#allocation3], 0  ;;  %s515_s0 = inlined_call_operand.hbm [shape: f32[1,128], index: 0, kind: input, shape index: {}]   ;;  %s516_s1 = inlined_call_operand.hbm [shape: f32[2,8], index: 1, kind: input, shape index: {}]   ;;  %s517_s2 = inlined_call_operand.hbm [shape: f32[2,256], index: 2, kind: output, shape index: {}]  }
   0x1   :  { %8 = vsyncpa [#allocation6], 0 }
   0x2   :  { %9 = vsyncpa [#allocation4], 0  ;;  %s451_s9 = smov [#allocation2]  }
   0x3   :  { %s16_s10 = sshll.u32 %s451_s9, 4  ;;  %s17_s10 = int_to_ptr.vmem [resolvable:$true] %s16_s10 }
   0x4   :  { %s393_s11 = scalar_lea.vmem %s17_s10, 16  ;;  %s397_s12 = scalar_lea.vmem %s17_s10, 32 }
   0x5   :  { %p394_p0 = scmp.ne.s32.totalorder %s17_s10, %s393_s11  ;;  %p398_p1 = scmp.lt.s32.totalorder %s17_s10, %s17_s10 }
   0x6   :  { %p399_p2 = scmp.lt.s32.totalorder %s397_s12, %s393_s11 }
   0x8   :  { %p400_p3 = por %p399_p2, %p398_p1 }
   0xa   :  { %p401_p4 = pnand %p400_p3, %p394_p0 }
   0xc   :  { %404 = shalt.err (!%p401_p4)
}
   0xd   :  { %19 = dma.hbm_to_vmem [thread:$0]  %s515_s0, 16, %s17_s10, [#allocation3]  }
   0xe   :  { %24 = vsyncadd [#allocation6], 96  ;;  %s452_s15 = smov [#allocation5]  }
   0xf   :  { %s25_s16 = sshll.u32 %s452_s15, 4  ;;  %s26_s16 = int_to_ptr.vmem [resolvable:$true] %s25_s16 }
  0x10   :  { %s413_s17 = scalar_lea.vmem %s26_s16, 32  ;;  %s417_s18 = scalar_lea.vmem %s26_s16, 128 }
  0x11   :  { %p414_p5 = scmp.ne.s32.totalorder %s26_s16, %s413_s17  ;;  %p418_p6 = scmp.lt.s32.totalorder %s26_s16, %s26_s16 }
  0x12   :  { %p419_p7 = scmp.lt.s32.totalorder %s417_s18, %s413_s17 }
  0x14   :  { %p420_p8 = por %p419_p7, %p418_p6 }
  0x16   :  { %p421_p9 = pnand %p420_p8, %p414_p5 }
  0x18   :  { %424 = shalt.err (!%p421_p9)
}
  0x19   :  { %s453_s19 = smov 32   ;;  %s454_s20 = smov 2  }
  0x1a   :  { %31 = dma.hbm_to_vmem [thread:$0]  %s516_s1, 32, %s26_s16, [#allocation6], %s453_s19, %s453_s19, %s454_s20  }
  0x1b   :  { %445 = dma.done.wait [#allocation3], 16  }
  0x1c   :  { %446 = vsyncadd [#allocation3], 4294967280 }
  0x1d   :  { %447 = dma.done.wait [#allocation6], 128  }
  0x1e   :  { %448 = vsyncadd [#allocation6], 4294967168  ;;  %v38_v0 = vld [vmem:[#allocation5] sm:$0xff]  ;;  %s455_s0 = smov 8   ;;  %vm43_vm0 = vcmask 64512   ;;  %s456_s23 = smov 16  }
  0x1f   :  { %40 = vrot.lane.b32.xlu0 %v38_v0, %s455_s0  ;;  %vm49_vm1 = vcmask 130048   ;;  %vm55_vm2 = vcmask 261120   ;;  %s457_s1 = smov 64   ;;  %vm61_vm3 = vcmask 523264   ;;  %v348_v7 = vld [vmem:[#allocation2] ss:$0 sm:$0xff] }
  0x20   :  { %v458_v21 = vmov 683565275   ;;  %v459_v23 = vmov 2475754826   ;;  %v460_v26 = vmov 2131351028  }
  0x21   :  { %v461_v29 = vmov 2102212464   ;;  %v462_v32 = vmov 920167782   ;;  %v463_v35 = vmov 1326507024  }
  0x91   :  { %v41_v1 = vpop.permute.xlu0 %40 }
  0x92   :  { %v44_v2 = vsel %vm43_vm0, %v38_v0, %v41_v1 }
  0x93   :  { %46 = vrot.lane.b32.xlu0 %v44_v2, %s456_s23 }
 0x105   :  { %v47_v3 = vpop.permute.xlu0 %46 }
 0x106   :  { %v50_v4 = vsel %vm49_vm1, %v44_v2, %v47_v3 }
 0x107   :  { %52 = vrot.lane.b32.xlu1 %v50_v4, %s453_s19 }
 0x179   :  { %v53_v5 = vpop.permute.xlu1 %52 }
 0x17a   :  { %v56_v6 = vsel %vm55_vm2, %v50_v4, %v53_v5 }
 0x17b   :  { %58 = vrot.lane.b32.xlu1 %v56_v6, %s457_s1 }
 0x1ed   :  { %v59_v8 = vpop.permute.xlu1 %58 }
 0x1ee   :  { %v62_v9 = vsel %vm61_vm3, %v56_v6, %v59_v8 }
 0x1ef   :  { %v489_v10 = vmul.f32 %v348_v7, %v62_v9 }
 0x1f1   :  { %v74_v11 = vand.u32 2139095040, %v489_v10  ;;  %v71_v15 = vand.u32 2147483647, %v489_v10  ;;  %vm73_vm11 = vcmp.lt.s32.totalorder %v489_v10, 0  ;;  %vm163_vm3 = vweird.f32 %v489_v10 }
 0x1f3   :  { %v75_v12 = vshrl.u32 %v74_v11, 23  ;;  %v78_v18 = vand.u32 8388607, %v71_v15  ;;  %vm72_vm12 = vcmp.le.f32.partialorder %v71_v15, 0.7853982 }
 0x1f5   :  { %v349_v13 = vadd.s32 4294967169, %v75_v12  ;;  %v79_v37 = vor.u32 8388608, %v78_v18 }
 0x1f7   :  { %v81_v14 = vadd.s32 1, %v349_v13  ;;  %v119_v51 = vshll.u32 %v79_v37, 8 }
 0x1f9   :  { %vm82_vm4 = vcmp.gt.s32.totalorder %v81_v14, 0 }
 0x1fa   :  { %v83_v16 = vsel %vm82_vm4, %v81_v14, 0 }
 0x1fb   :  { %v85_v17 = vand.u32 31, %v83_v16  ;;  %v84_v20 = vshrl.u32 %v83_v16, 5 }
 0x1fd   :  { %v86_v19 = vsub.s32 32, %v85_v17  ;;  %v88_v22 = vshll.u32 %v458_v21, %v85_v17  ;;  %v91_v24 = vshll.u32 %v459_v23, %v85_v17  ;;  %v94_v28 = vshll.u32 %v460_v26, %v85_v17 }
 0x1fe   :  { %v97_v31 = vshll.u32 %v461_v29, %v85_v17  ;;  %v100_v34 = vshll.u32 %v462_v32, %v85_v17  ;;  %vm103_vm5 = vcmp.lt.s32.totalorder %v84_v20, 1  ;;  %vm106_vm6 = vcmp.lt.s32.totalorder %v84_v20, 4 }
 0x1ff   :  { %v89_v25 = vshrl.u32 %v459_v23, %v86_v19  ;;  %v92_v27 = vshrl.u32 %v460_v26, %v86_v19  ;;  %v95_v30 = vshrl.u32 %v461_v29, %v86_v19  ;;  %v98_v33 = vshrl.u32 %v462_v32, %v86_v19 }
 0x200   :  { %v101_v36 = vshrl.u32 %v463_v35, %v86_v19  ;;  %v87_v46 = vshrl.u32 %v458_v21, %v86_v19  ;;  %vm105_vm7 = vcmp.lt.s32.totalorder %v84_v20, 3  ;;  %vm104_vm8 = vcmp.lt.s32.totalorder %v84_v20, 2 }
 0x201   :  { %v90_v38 = vor.u32 %v89_v25, %v88_v22  ;;  %v93_v39 = vor.u32 %v92_v27, %v91_v24  ;;  %v96_v40 = vor.u32 %v95_v30, %v94_v28  ;;  %v99_v41 = vor.u32 %v98_v33, %v97_v31 }
 0x202   :  { %v102_v42 = vor.u32 %v101_v36, %v100_v34  ;;  %v464_v30 = vmov 1983009808   ;;  %v180_v32 = vlaneseq }
 0x203   :  { %v108_v43 = vsel %vm106_vm6, %v96_v40, 2102212464  ;;  %v111_v44 = vsel %vm103_vm5, %v90_v38, %v93_v39  ;;  %v115_v45 = vsel %vm103_vm5, %v93_v39, %v96_v40  ;;  %v112_v47 = vsel %vm106_vm6, %v99_v41, 920167782 }
 0x204   :  { %v116_v48 = vsel %vm106_vm6, %v102_v42, 1326507024  ;;  %v113_v49 = vsel %vm105_vm7, %v96_v40, %v112_v47  ;;  %v107_v52 = vsel %vm103_vm5, %v87_v46, %v90_v38  ;;  %v109_v53 = vsel %vm105_vm7, %v93_v39, %v108_v43 }
 0x205   :  { %v117_v50 = vsel %vm105_vm7, %v99_v41, %v116_v48  ;;  %v114_v54 = vsel %vm104_vm8, %v111_v44, %v113_v49  ;;  %v110_v60 = vsel %vm104_vm8, %v107_v52, %v109_v53  ;;  %v178_v31 = vunpack.c.l.s4 %v464_v30 }
 0x206   :  { %v118_v55 = vsel %vm104_vm8, %v115_v45, %v117_v50  ;;  %v498_v58 = vmul.u32.u64.low %v119_v51, %v114_v54  ;;  %v499_v59 = vmul.u32.u64.high %v119_v51, %v114_v54, %v498_v58  ;;  %v126_v62 = vmul.u32 %v119_v51, %v110_v60 }
 0x207   :  { %v495_v56 = vmul.u32.u64.low %v119_v51, %v118_v55  ;;  %v496_v57 = vmul.u32.u64.high %v119_v51, %v118_v55, %v495_v56  ;;  %v179_v34 = vunpack.c.0.s8 %v178_v31  ;;  %v181_v35 = vshrl.u32 %v180_v32, 7 }
 0x208   :  { %v129_v61 = vadd.s32 1, %v499_v59 }
 0x209   :  { %vm128_vm9 = vc.u32 %v496_v57, %v498_v58  ;;  %v127_v11 = vadd.s32 %v498_v58, %v496_v57  ;;  %v182_v41 = vsub.s32 %v179_v34, %v181_v35 }
 0x20a   :  { %v130_v63 = vsel %vm128_vm9, %v129_v61, %v499_v59 }
 0x20b   :  { %v131_v0 = vadd.s32 %v130_v63, %v126_v62 }
 0x20d   :  { %v132_v1 = vadd.s32 536870912, %v131_v0 }
 0x20f   :  { %v133_v2 = vshrl.u32 %v132_v1, 30 }
 0x211   :  { %v134_v3 = vshll.u32 %v133_v2, 30  ;;  %v157_v25 = vsub.s32 4, %v133_v2 }
 0x213   :  { %v135_v4 = vsub.s32 %v131_v0, %v134_v3  ;;  %v158_v28 = vsel %vm73_vm11, %v157_v25, %v133_v2 }
 0x214   :  { %v160_v29 = vsel %vm72_vm12, 0, %v158_v28 }
 0x215   :  { %v137_v5 = vsub.s32 0, %v135_v4  ;;  %v164_v33 = vadd.s32 3, %v160_v29  ;;  %v294_v37 = vand.u32 3, %v160_v29 }
 0x217   :  { %v350_v6 = vmin.u32 %v137_v5, %v135_v4  ;;  %v165_v36 = vand.u32 3, %v164_v33  ;;  %vm299_vm14 = vcmp.eq.s32.totalorder %v294_v37, 2  ;;  %vm296_vm0 = vcmp.eq.s32.totalorder %v294_v37, 0 }
 0x218   :  { %vm295_vm2 = vcmp.lt.s32.totalorder %v294_v37, 2 }
 0x219   :  { %v139_v7 = vclz %v350_v6  ;;  %vm170_vm13 = vcmp.eq.s32.totalorder %v165_v36, 2  ;;  %vm167_vm15 = vcmp.eq.s32.totalorder %v165_v36, 0  ;;  %vm166_vm1 = vcmp.lt.s32.totalorder %v165_v36, 2 }
 0x21b   :  { %v351_v8 = vadd.s32 4294967294, %v139_v7 }
 0x21d   :  { %vm352_vm10 = vcmp.lt.s32.totalorder %v351_v8, 0 }
 0x21e   :  { %v142_v9 = vsel %vm352_vm10, 0, %v351_v8 }
 0x21f   :  { %v143_v12 = vsub.s32 32, %v142_v9  ;;  %v147_v13 = vsub.s32 4294967266, %v142_v9  ;;  %v144_v14 = vshll.u32 %v135_v4, %v142_v9 }
 0x221   :  { %v145_v16 = vshrl.u32 %v127_v11, %v143_v12  ;;  %v148_v17 = vadd.s32 127, %v147_v13 }
 0x223   :  { %v146_v18 = vor.u32 %v145_v16, %v144_v14  ;;  %v149_v19 = vshll.u32 %v148_v17, 23 }
 0x225   :  { %v150_v20 = vor.u32 4788187, %v149_v19  ;;  %v153_v22 = vcvt.s32.f32 %v146_v18 }
 0x227   :  { %v151_v21 = vand.u32 2147483647, %v150_v20 }
 0x229   :  { %v154_v23 = vmul.f32 %v153_v22, %v151_v21 }
 0x22b   :  { %v155_v24 = vxor.u32 2147483648, %v154_v23 }
 0x22d   :  { %v156_v26 = vsel %vm73_vm11, %v155_v24, %v154_v23 }
 0x22e   :  { %v159_v27 = vsel %vm72_vm12, %v489_v10, %v156_v26 }
 0x22f   :  { %381 = vcosq.f32 %v159_v27 }
 0x230   :  { %383 = vsinq.f32 %v159_v27 }
 0x23c   :  { %v382_v38 = vpop.eup %381 }
 0x23d   :  { %v384_v39 = vpop.eup %383  ;;  %v171_v40 = vxor.u32 2147483648, %v382_v38 }
 0x23e   :  { %v168_v15 = vxor.u32 2147483648, %v384_v39 }
 0x23f   :  { %v172_v42 = vsel %vm170_vm13, %v171_v40, %v384_v39  ;;  %v301_v43 = vsel %vm299_vm14, %v171_v40, %v384_v39 }
 0x240   :  { %v169_v44 = vsel %vm167_vm15, %v382_v38, %v168_v15  ;;  %v298_v45 = vsel %vm296_vm0, %v382_v38, %v168_v15 }
 0x241   :  { %v173_v46 = vsel %vm166_vm1, %v169_v44, %v172_v42  ;;  %v302_v47 = vsel %vm295_vm2, %v298_v45, %v301_v43 }
 0x242   :  { %v174_v48 = vsel %vm163_vm3, nan, %v173_v46  ;;  %v303_v49 = vsel %vm163_vm3, nan, %v302_v47 }
 0x243   :  { %v176_v50 = vcombine.high %v174_v48, %v174_v48  ;;  %v183_v51 = vrot.slane %v174_v48, %v182_v41  ;;  %353 = vst.sshfl [vmem:[#allocation7] sm:$0x3 pattern:$0x76325410] %v174_v48  ;;  %v305_v52 = vcombine.high %v303_v49, %v303_v49  ;;  %v312_v53 = vrot.slane %v303_v49, %v182_v41 }
 0x244   :  { %359 = vst.sshfl [vmem:[#allocation7 + $0x2] sm:$0x3 pattern:$0x76325410] %v303_v49 }
 0x245   :  { %v190_v54 = vrot.slane %v176_v50, %v182_v41  ;;  %v191_v55 = vcombine.high %v183_v51, %v183_v51  ;;  %354 = vst.sshfl [vmem:[#allocation7 + $0x8] sm:$0x3 pattern:$0x76325410] %v176_v50  ;;  %v319_v56 = vrot.slane %v305_v52, %v182_v41  ;;  %v320_v57 = vcombine.high %v312_v53, %v312_v53 }
 0x246   :  { %360 = vst.sshfl [vmem:[#allocation7 + $0xa] sm:$0x3 pattern:$0x76325410] %v305_v52 }
 0x247   :  { %v192_v58 = vcombine.high %v190_v54, %v190_v54  ;;  %198 = vst [vmem:[#allocation7 + $0x4] sm:$0x3] %v191_v55  ;;  %v321_v59 = vcombine.high %v319_v56, %v319_v56  ;;  %327 = vst [vmem:[#allocation7 + $0x6] sm:$0x3] %v320_v57 }
 0x249   :  { %200 = vst [vmem:[#allocation7 + $0xc] sm:$0x3] %v192_v58  ;;  %329 = vst [vmem:[#allocation7 + $0xe] sm:$0x3] %v321_v59 }
 0x24a   :  { %334 = vsyncadd [#allocation4], 192  ;;  %s465_s24 = smov [#allocation7]  }
 0x24b   :  { %s335_s25 = sshll.u32 %s465_s24, 4  ;;  %s336_s25 = int_to_ptr.vmem [resolvable:$true] %s335_s25 }
 0x24c   :  { %s425_s26 = scalar_lea.vmem %s336_s25, 64  ;;  %s429_s27 = scalar_lea.vmem %s336_s25, 256 }
 0x24d   :  { %p426_p10 = scmp.ne.s32.totalorder %s336_s25, %s425_s26  ;;  %p430_p11 = scmp.lt.s32.totalorder %s336_s25, %s336_s25 }
 0x24e   :  { %p431_p12 = scmp.lt.s32.totalorder %s429_s27, %s425_s26 }
 0x250   :  { %p432_p13 = por %p431_p12, %p430_p11 }
 0x252   :  { %p433_p0 = pnand %p432_p13, %p426_p10 }
 0x254   :  { %436 = shalt.err (!%p433_p0)
}
 0x255   :  { %s466_s28 = smov 4  }
 0x256   :  { %341 = dma.vmem_to_hbm [thread:$0]  %s336_s25, 64, %s517_s2, [#allocation4], %s457_s1, %s457_s1, %s466_s28  }
 0x257   :  { %449 = dma.done.wait [#allocation4], 256  }
 0x258   :  { %450 = vsyncadd [#allocation4], 4294967040 }
 0x259   :  { %345 = vsyncpa [#allocation3], 1 }
 0x25a   :  { %346 = vsyncpa [#allocation6], 1 }
 0x25b   :  { %347 = vsyncpa [#allocation4], 1 }

</bundles_post_ra>
